<compile_context>
chip_gen: v5e
topology: v5e:2x2
jax: 0.10.0
libtpu: 0.0.40
codegen_flags: <defaults>
</compile_context>

<pallas_src>
import jax
import jax.numpy as jnp
from jax.experimental import pallas as pl
from jax.experimental.pallas import tpu as pltpu

_SUBLANES = 8
_LANES = 128
_MAX_TB = 256     # batch rows per tile (sublane axis)
_MAX_TN = 8192    # item lanes per tile (lane axis); 2*TB*TN*4B = 16 MiB double-buffered


def _round_up(x, m):
    return ((x + m - 1) // m) * m


def _irt_1pl_kernel(theta_ref, diff_ref, out_ref):
    # theta_ref: (TB, 1)  f32 — per-person summed ability (precomputed)
    # diff_ref:  (1, TN)  f32 — item difficulty row (lane-dense, zero padded)
    # out_ref:   (TB, TN) f32 — lane/sublane-dense output tile
    logit = theta_ref[...] + diff_ref[...]               # VPU broadcast-add -> (TB, TN)
    out_ref[...] = 0.5 * (jnp.tanh(0.5 * logit) + 1.0)   # sigmoid via EUP tanh


def mle_1pl_forward(index, response, mask, ability_table, item_feat_table):
    """Equivalent of MLE_1PL.forward(index, response, mask)."""
    del response, mask  # unused by the 1PL decode path (kept for API parity)
    B = index.shape[0]
    num_item = item_feat_table.shape[0]

    # Hoisted ability reduction: theta[b] = sum_d ability_table[index[b], d].
    theta = jnp.sum(ability_table.astype(jnp.float32), axis=1)[index.astype(jnp.int32)]

    # Tile sizing: sublane-dense batch, lane-dense items; cap for VMEM budget.
    tb = min(_MAX_TB, _round_up(B, _SUBLANES))
    tn = min(_MAX_TN, _round_up(num_item, _LANES))
    b_pad = _round_up(B, tb)
    n_pad = _round_up(num_item, tn)

    theta_col = jnp.pad(theta, (0, b_pad - B)).reshape(b_pad, 1)
    diff_row = jnp.pad(
        item_feat_table.astype(jnp.float32).reshape(num_item),
        (0, n_pad - num_item),
    ).reshape(1, n_pad)

    grid = (b_pad // tb, n_pad // tn)
    out = pl.pallas_call(
        _irt_1pl_kernel,
        out_shape=jax.ShapeDtypeStruct((b_pad, n_pad), jnp.float32),
        grid=grid,
        in_specs=[
            pl.BlockSpec((tb, 1), lambda i, j: (i, 0)),   # theta column tile
            pl.BlockSpec((1, tn), lambda i, j: (0, j)),   # difficulty row tile
        ],
        out_specs=pl.BlockSpec((tb, tn), lambda i, j: (i, j)),
        compiler_params=pltpu.CompilerParams(
            dimension_semantics=("parallel", "parallel"),  # v7x megacore; no-op elsewhere
            vmem_limit_bytes=48 * 1024 * 1024,             # explicit; covers v5e's 16 MiB default
        ),
    )(theta_col, diff_row)

    # Torch returns (B, num_item, 1).  The slice + trailing unsqueeze is an XLA
    # relayout; consumers that can take the lane-dense (B, num_item) (or the
    # padded (b_pad, n_pad)) slab directly should do the unsqueeze themselves.
    return out[:B, :num_item][..., None]


if __name__ == "__main__":
    key = jax.random.PRNGKey(0)
    latent_dim, num_person, num_item = 32, 20, 16
    B = 4

    k_ability, k_item, k_idx = jax.random.split(key, 3)
    # nn.Embedding default init is N(0, 1); weights_init() leaves Embeddings untouched.
    ability_table = jax.random.normal(k_ability, (num_person, latent_dim), jnp.float32)
    item_feat_table = jax.random.normal(k_item, (num_item, 1), jnp.float32)

    index = jax.random.randint(k_idx, (B,), 0, num_person, dtype=jnp.int32)
    response = jnp.zeros((B, num_item), jnp.float32)  # unused by forward
    mask = jnp.ones((B, num_item), jnp.float32)       # unused by forward

    out = mle_1pl_forward(index, response, mask, ability_table, item_feat_table)
    out = jax.block_until_ready(out)

    # Pure-JAX reference for correctness.
    ref = jax.nn.sigmoid(
        jnp.sum(ability_table[index], axis=1, keepdims=True) + item_feat_table.T
    )[..., None]

    assert out.shape == (B, num_item, 1), out.shape
    assert jnp.allclose(out, ref, atol=1e-5), float(jnp.max(jnp.abs(out - ref)))
    print("KERNEL_OK")
</pallas_src>

<mosaic_0001>
module attributes {stable_mosaic.version = 11 : i64} {
  func.func @_irt_1pl_kernel(%arg0: i32, %arg1: i32, %arg2: memref<8x1xf32, #tpu.memory_space<vmem>>, %arg3: memref<1x128xf32, #tpu.memory_space<vmem>>, %arg4: memref<8x128xf32, #tpu.memory_space<vmem>>) attributes {dimension_semantics = [#tpu.dimension_semantics<parallel>, #tpu.dimension_semantics<parallel>], iteration_bounds = array<i64: 1, 1>, scalar_prefetch = 0 : i64, scratch_operands = 0 : i64, tpu.core_type = #tpu.core_type<tc>, window_params = [{transform_indices = @transform_0, window_bounds = array<i64: 8, 1>}, {transform_indices = @transform_1, window_bounds = array<i64: 1, 128>}, {transform_indices = @transform_2, window_bounds = array<i64: 8, 128>}]} {
    %c0 = arith.constant 0 : index
    %c0_0 = arith.constant 0 : index
    %0 = vector.load %arg2[%c0, %c0_0] : memref<8x1xf32, #tpu.memory_space<vmem>>, vector<8x1xf32>
    %c0_1 = arith.constant 0 : index
    %c0_2 = arith.constant 0 : index
    %1 = vector.load %arg3[%c0_1, %c0_2] : memref<1x128xf32, #tpu.memory_space<vmem>>, vector<1x128xf32>
    %2 = vector.broadcast %0 : vector<8x1xf32> to vector<8x128xf32>
    %3 = vector.broadcast %1 : vector<1x128xf32> to vector<8x128xf32>
    %4 = arith.addf %2, %3 : vector<8x128xf32>
    %cst = arith.constant 5.000000e-01 : f32
    %5 = vector.broadcast %cst : f32 to vector<8x128xf32>
    %6 = arith.mulf %5, %4 : vector<8x128xf32>
    %7 = math.tanh %6 : vector<8x128xf32>
    %cst_3 = arith.constant 1.000000e+00 : f32
    %8 = vector.broadcast %cst_3 : f32 to vector<8x128xf32>
    %9 = arith.addf %7, %8 : vector<8x128xf32>
    %cst_4 = arith.constant 5.000000e-01 : f32
    %10 = vector.broadcast %cst_4 : f32 to vector<8x128xf32>
    %11 = arith.mulf %10, %9 : vector<8x128xf32>
    %c0_5 = arith.constant 0 : index
    %c0_6 = arith.constant 0 : index
    %12 = vector.load %arg4[%c0_5, %c0_6] : memref<8x128xf32, #tpu.memory_space<vmem>>, vector<8x128xf32>
    tpu.vector_store %arg4[%c0_5, %c0_6], %11 {strides = array<i32>} : memref<8x128xf32, #tpu.memory_space<vmem>>, vector<8x128xf32>,
    return
  }
  func.func @transform_0(%arg0: i32, %arg1: i32) -> (i32, i32) {
    %c0_i32 = arith.constant 0 : i32
    %c0_i32_0 = arith.constant 0 : i32
    return %arg0, %c0_i32 : i32, i32
  }
  func.func @transform_1(%arg0: i32, %arg1: i32) -> (i32, i32) {
    %c0_i32 = arith.constant 0 : i32
    %c0_i32_0 = arith.constant 0 : i32
    return %c0_i32, %arg1 : i32, i32
  }
  func.func @transform_2(%arg0: i32, %arg1: i32) -> (i32, i32) {
    %c0_i32 = arith.constant 0 : i32
    return %arg0, %arg1 : i32, i32
  }
}

</mosaic_0001>

<bundles_post_ra>
// kernel: tpu_custom_call.1
= control target key start
LH: loop header
LB: loop body
LE: loop exit
PB: predicated region body
PF: predicated region fallthrough
CT: control target
= control target key end

     0   :  { %v76_v1 = vmov 0   ;;  %s102_s0 = inlined_call_operand.vmem [shape: f32[8,1], index: 0, kind: input, shape index: {}]   ;;  %s103_s1 = inlined_call_operand.vmem [shape: f32[1,128], index: 1, kind: input, shape index: {}]   ;;  %s104_s2 = inlined_call_operand.hbm [shape: f32[8,128], index: 2, kind: output, shape index: {}]  }
   0x1   :  { %v12_v0 = vld [vmem:[%s102_s0] sm:$0xff]  ;;  %46 = vset.pattern.permute.xlu0 %v76_v1 }
   0x2   :  { %7 = vsyncpa [#allocation3], 0  ;;  %16 = vperm.xlu0 %46, %v12_v0   ;;  %v47_v2 = vld [vmem:[%s103_s1] ss:$0 sm:$0xff]  ;;  %s77_s13 = smov [#allocation2]   ;;  %s35_s17 = sshll.u32 %s104_s2, 4  ;;  %s36_s17 = int_to_ptr.hbm [resolvable:$true] %s35_s17 }
   0x3   :  { %s33_s14 = sshll.u32 %s77_s13, 4  ;;  %s34_s14 = int_to_ptr.vmem [resolvable:$true] %s33_s14 }
  0x74   :  { %v17_v3 = vpop.permute.xlu0 %16 }
  0x75   :  { %v22_v4 = vadd.f32 %v47_v2, %v17_v3 }
  0x77   :  { %v23_v5 = vmul.f32 0.5, %v22_v4 }
  0x79   :  { %48 = vtanh.f32 %v23_v5 }
  0x7f   :  { %v49_v6 = vpop.eup %48 }
  0x80   :  { %v25_v7 = vadd.f32 1.0, %v49_v6 }
  0x82   :  { %v26_v8 = vmul.f32 0.5, %v25_v7 }
  0x84   :  { %27 = vst [vmem:[#allocation2] sm:$0xff] %v26_v8 }
  0x85   :  { %38 = dma.vmem_to_hbm [thread:$0]  %s34_s14, 128, %s36_s17, [#allocation3]  }
  0x86   :  { %74 = dma.done.wait [#allocation3], 128  }
  0x87   :  { %75 = vsyncadd [#allocation3], 4294967168 }
  0x88   :  { %43 = vsyncpa [#allocation3], 1 }

</bundles_post_ra>
